<compile_context>
chip_gen: v5e
topology: v5e:2x2
jax: 0.10.0
libtpu: 0.0.40
codegen_flags: <defaults>
</compile_context>

<pallas_src>
import functools

import jax
import jax.numpy as jnp
from jax.experimental import pallas as pl
from jax.experimental.pallas import tpu as pltpu

GAMMA = 3.0  # kernel uses u*u*u because gamma is the integer 3


def _round_up(x, m):
    return ((x + m - 1) // m) * m


def _vmem_capacity_bytes():
    """Per-core VMEM capacity; conservative 64 MiB (v7x per-TC) fallback."""
    try:
        return int(pltpu.get_tpu_info().vmem_capacity_bytes)
    except Exception:  # interpret mode / older runtimes
        return 64 * 1024 * 1024


def _default_num_parts():
    """2 row-halves only on 2-TensorCore chips (v7x); 1 on v5e/v6e."""
    try:
        kind = jax.devices()[0].device_kind.lower()
        if "v7" in kind:
            return 2
    except Exception:
        pass
    return 1


def _focal_loss_kernel(x_ref, t_ref, out_ref, acc_ref, *,
                       n_total, tile_n, inner_steps, inv_n):
    p = pl.program_id(0)   # part (row-half) index
    s = pl.program_id(1)   # inner step over this part's row tiles

    @pl.when(s == 0)
    def _init():
        acc_ref[...] = jnp.zeros_like(acc_ref)

    x = x_ref[...].astype(jnp.float32)        # (tile_n, C) logits, f32 in-vreg
    tgt = t_ref[...]                          # (tile_n, 1) int32 class ids

    # Numerically-stable per-row logsumexp; reuse (x - m) for the gather too.
    m = jnp.max(x, axis=-1, keepdims=True)                       # (tile_n, 1)
    xm = x - m
    sum_ex = jnp.sum(jnp.exp(xm), axis=-1, keepdims=True)        # (tile_n, 1)

    cols = jax.lax.broadcasted_iota(jnp.int32, x.shape, 1)       # (tile_n, C)
    xm_tgt = jnp.sum(jnp.where(cols == tgt, xm, 0.0),
                     axis=-1, keepdims=True)                     # (tile_n, 1)

    # CE = (m + log(sum_ex)) - (m + xm_tgt); this form is always >= 0.
    ce = jnp.log(sum_ex) - xm_tgt
    pt = jnp.exp(-ce)
    u = 1.0 - pt
    fl = u * u * u * ce                                          # integer cube

    # Mask rows beyond the true N (ragged last tile / fully OOB clamped tile).
    # Keep this as a select (jnp.where), never a multiply.
    block_row = p * inner_steps + s
    rows = block_row * tile_n + jax.lax.broadcasted_iota(jnp.int32, fl.shape, 0)
    fl = jnp.where(rows < n_total, fl, 0.0)

    # Per-row accumulation: no per-step full reduce, no 1-element RMW chain.
    acc_ref[...] += fl

    @pl.when(s == inner_steps - 1)
    def _finalize():
        # Single reduction per part; lane-dense (8, 128) store.
        part_sum = jnp.sum(acc_ref[...], keepdims=True)          # (1, 1)
        out_ref[...] = jnp.broadcast_to(part_sum * inv_n, out_ref.shape)


def focal_loss(inputs, targets, *, tile_n=None, num_parts=None):
    """inputs: (N, C) logits (any float dtype); targets: (N,) int class ids.

    Returns the scalar mean focal loss (float32), matching PyTorch FocalLoss
    with gamma=3.0 and reduction='mean'.
    """
    n, c = inputs.shape
    t2d = targets.astype(jnp.int32).reshape(n, 1)

    if num_parts is None:
        num_parts = _default_num_parts()
    num_parts = max(1, int(num_parts))

    # ---- dtype- and chip-aware tile / VMEM sizing -------------------------
    vmem_cap = _vmem_capacity_bytes()
    budget = vmem_cap // 2                 # working-set target (~64 MiB on
    #                                        v5e/v6e, ~32 MiB on v7x)
    itemsize = inputs.dtype.itemsize
    c_pad = _round_up(c, 128)              # VMEM lane padding of the C axis

    # Estimated VMEM bytes per logits row across the whole pipeline:
    per_row = (2 * c_pad * itemsize        # double-buffered logits block
               + 2 * 128 * 4               # double-buffered targets block
               + 4 * c_pad * 4             # f32 upcast / exp / select temps
               + 8 * 128 * 4)              # (tile_n, 1) temps + accumulator

    if tile_n is None:
        tile_n = budget // per_row
        tile_n = max(8, min(tile_n, 16384))
    # Sublane dim must be a multiple of 8; no larger than one part's rows.
    tile_n = min(tile_n, _round_up(pl.cdiv(n, num_parts), 8))
    tile_n = max(8, (tile_n // 8) * 8)

    vmem_limit = tile_n * per_row + (8 << 20)               # + headroom
    vmem_limit = int(min(max(vmem_limit, 32 << 20), (vmem_cap * 7) // 8))

    n_blocks = pl.cdiv(n, tile_n)            # row tiles covering the real data
    inner = pl.cdiv(n_blocks, num_parts)     # inner grid steps per part
    last_block = n_blocks - 1

    def row_map(p, s):
        # Clamp so the generated DMA never targets a fully out-of-range block;
        # the kernel masks those rows to contribute zero anyway.
        return (jnp.minimum(p * inner + s, last_block), 0)

    kernel = functools.partial(
        _focal_loss_kernel,
        n_total=n, tile_n=tile_n, inner_steps=inner, inv_n=1.0 / n)

    out = pl.pallas_call(
        kernel,
        out_shape=jax.ShapeDtypeStruct((num_parts * 8, 128), jnp.float32),
        grid_spec=pltpu.PrefetchScalarGridSpec(
            num_scalar_prefetch=0,
            grid=(num_parts, inner),
            in_specs=[
                pl.BlockSpec((tile_n, c), row_map),
                pl.BlockSpec((tile_n, 1), row_map),
            ],
            out_specs=pl.BlockSpec((8, 128), lambda p, s: (p, 0)),
            scratch_shapes=[pltpu.VMEM((tile_n, 1), jnp.float32)],
        ),
        compiler_params=pltpu.CompilerParams(
            dimension_semantics=("parallel", "arbitrary"),
            vmem_limit_bytes=vmem_limit,
        ),
    )(inputs, t2d)

    # Each part already divided by the full N; sum the per-part partial means.
    return jnp.sum(out[::8, 0])


if __name__ == "__main__":
    key = jax.random.PRNGKey(0)
    k1, k2 = jax.random.split(key)

    N, C = 200, 32   # small classification problem; N is not a tile multiple
    logits = jax.random.normal(k1, (N, C), dtype=jnp.float32)
    targets = jax.random.randint(k2, (N,), 0, C, dtype=jnp.int32)

    # Small tile so the grid has several inner steps plus a ragged last tile.
    loss = focal_loss(logits, targets, tile_n=32)
    jax.block_until_ready(loss)

    # Also exercise the auto tile / auto num_parts path once.
    loss_auto = focal_loss(logits, targets)
    jax.block_until_ready(loss_auto)

    # Pure-JAX reference check.
    lse = jax.nn.logsumexp(logits, axis=1)
    ce = lse - logits[jnp.arange(N), targets]
    pt = jnp.exp(-ce)
    ref = jnp.mean((1.0 - pt) ** GAMMA * ce)
    assert jnp.allclose(loss, ref, rtol=1e-5, atol=1e-5), (loss, ref)
    assert jnp.allclose(loss_auto, ref, rtol=1e-5, atol=1e-5), (loss_auto, ref)

    print("KERNEL_OK")
</pallas_src>

<mosaic_0001>
module attributes {stable_mosaic.version = 11 : i64} {
  func.func @_focal_loss_kernel(%arg0: i32, %arg1: i32, %arg2: memref<32x32xf32, #tpu.memory_space<vmem>>, %arg3: memref<32x1xi32, #tpu.memory_space<vmem>>, %arg4: memref<8x128xf32, #tpu.memory_space<vmem>>, %arg5: memref<32x1xf32, #tpu.memory_space<vmem>>) attributes {dimension_semantics = [#tpu.dimension_semantics<parallel>, #tpu.dimension_semantics<arbitrary>], iteration_bounds = array<i64: 1, 7>, scalar_prefetch = 0 : i64, scratch_operands = 1 : i64, tpu.core_type = #tpu.core_type<tc>, window_params = [{transform_indices = @transform_0, window_bounds = array<i64: 32, 32>}, {transform_indices = @transform_1, window_bounds = array<i64: 32, 1>}, {transform_indices = @transform_2, window_bounds = array<i64: 8, 128>}]} {
    %c0_i32 = arith.constant 0 : i32
    %0 = arith.cmpi eq, %arg1, %c0_i32 : i32
    %1 = arith.extui %0 : i1 to i32
    %c0_i32_0 = arith.constant 0 : i32
    %2 = arith.cmpi ne, %1, %c0_i32_0 : i32
    scf.if %2 {
      %cst_15 = arith.constant 0.000000e+00 : f32
      %45 = vector.broadcast %cst_15 : f32 to vector<32x1xf32>
      %c0_16 = arith.constant 0 : index
      %c0_17 = arith.constant 0 : index
      %46 = vector.load %arg5[%c0_16, %c0_17] : memref<32x1xf32, #tpu.memory_space<vmem>>, vector<32x1xf32>
      tpu.vector_store %arg5[%c0_16, %c0_17], %45 {strides = array<i32>} : memref<32x1xf32, #tpu.memory_space<vmem>>, vector<32x1xf32>,
    } else {
    }
    %c0 = arith.constant 0 : index
    %c0_1 = arith.constant 0 : index
    %3 = vector.load %arg2[%c0, %c0_1] : memref<32x32xf32, #tpu.memory_space<vmem>>, vector<32x32xf32>
    %c0_2 = arith.constant 0 : index
    %c0_3 = arith.constant 0 : index
    %4 = vector.load %arg3[%c0_2, %c0_3] : memref<32x1xi32, #tpu.memory_space<vmem>>, vector<32x1xi32>
    %cst = arith.constant dense<0xFF800000> : vector<32xf32>
    %5 = vector.multi_reduction <maximumf>, %3, %cst [1] : vector<32x32xf32> to vector<32xf32>
    %6 = vector.shape_cast %5 : vector<32xf32> to vector<32x1xf32>
    %7 = vector.broadcast %6 : vector<32x1xf32> to vector<32x32xf32>
    %8 = arith.subf %3, %7 : vector<32x32xf32>
    %9 = math.exp %8 : vector<32x32xf32>
    %cst_4 = arith.constant dense<0.000000e+00> : vector<32xf32>
    %10 = vector.multi_reduction <add>, %9, %cst_4 [1] : vector<32x32xf32> to vector<32xf32>
    %11 = vector.shape_cast %10 : vector<32xf32> to vector<32x1xf32>
    %12 = tpu.iota {dimensions = array<i32: 1>} : vector<32x32xi32>
    %13 = vector.broadcast %4 : vector<32x1xi32> to vector<32x32xi32>
    %14 = arith.cmpi eq, %12, %13 : vector<32x32xi32>
    %cst_5 = arith.constant 0.000000e+00 : f32
    %15 = vector.broadcast %cst_5 : f32 to vector<32x32xf32>
    %16 = arith.select %14, %8, %15 : vector<32x32xi1>, vector<32x32xf32>
    %cst_6 = arith.constant dense<0.000000e+00> : vector<32xf32>
    %17 = vector.multi_reduction <add>, %16, %cst_6 [1] : vector<32x32xf32> to vector<32xf32>
    %18 = vector.shape_cast %17 : vector<32xf32> to vector<32x1xf32>
    %19 = math.log %11 : vector<32x1xf32>
    %20 = arith.subf %19, %18 : vector<32x1xf32>
    %cst_7 = arith.constant 0.000000e+00 : f32
    %21 = vector.broadcast %cst_7 : f32 to vector<32x1xf32>
    %22 = arith.subf %21, %20 : vector<32x1xf32>
    %23 = math.exp %22 : vector<32x1xf32>
    %cst_8 = arith.constant 1.000000e+00 : f32
    %24 = vector.broadcast %cst_8 : f32 to vector<32x1xf32>
    %25 = arith.subf %24, %23 : vector<32x1xf32>
    %26 = arith.mulf %25, %25 : vector<32x1xf32>
    %27 = arith.mulf %26, %25 : vector<32x1xf32>
    %28 = arith.mulf %27, %20 : vector<32x1xf32>
    %c7_i32 = arith.constant 7 : i32
    %29 = arith.muli %arg0, %c7_i32 : i32
    %30 = arith.addi %29, %arg1 : i32
    %c32_i32 = arith.constant 32 : i32
    %31 = arith.muli %30, %c32_i32 : i32
    %32 = tpu.iota {dimensions = array<i32: 0>} : vector<32x1xi32>
    %33 = vector.broadcast %31 : i32 to vector<32x1xi32>
    %34 = arith.addi %33, %32 : vector<32x1xi32>
    %c200_i32 = arith.constant 200 : i32
    %35 = vector.broadcast %c200_i32 : i32 to vector<32x1xi32>
    %36 = arith.cmpi slt, %34, %35 : vector<32x1xi32>
    %cst_9 = arith.constant 0.000000e+00 : f32
    %37 = vector.broadcast %cst_9 : f32 to vector<32x1xf32>
    %38 = arith.select %36, %28, %37 : vector<32x1xi1>, vector<32x1xf32>
    %c0_10 = arith.constant 0 : index
    %c0_11 = arith.constant 0 : index
    %39 = vector.load %arg5[%c0_10, %c0_11] : memref<32x1xf32, #tpu.memory_space<vmem>>, vector<32x1xf32>
    %40 = arith.addf %39, %38 : vector<32x1xf32>
    %c0_12 = arith.constant 0 : index
    %c0_13 = arith.constant 0 : index
    %41 = vector.load %arg5[%c0_12, %c0_13] : memref<32x1xf32, #tpu.memory_space<vmem>>, vector<32x1xf32>
    tpu.vector_store %arg5[%c0_12, %c0_13], %40 {strides = array<i32>} : memref<32x1xf32, #tpu.memory_space<vmem>>, vector<32x1xf32>,
    %c6_i32 = arith.constant 6 : i32
    %42 = arith.cmpi eq, %arg1, %c6_i32 : i32
    %43 = arith.extui %42 : i1 to i32
    %c0_i32_14 = arith.constant 0 : i32
    %44 = arith.cmpi ne, %43, %c0_i32_14 : i32
    scf.if %44 {
      %c0_15 = arith.constant 0 : index
      %c0_16 = arith.constant 0 : index
      %45 = vector.load %arg5[%c0_15, %c0_16] : memref<32x1xf32, #tpu.memory_space<vmem>>, vector<32x1xf32>
      %46 = vector.shape_cast %45 : vector<32x1xf32> to vector<1x32x1xf32>
      %cst_17 = arith.constant dense<0.000000e+00> : vector<1xf32>
      %47 = vector.multi_reduction <add>, %46, %cst_17 [1, 2] : vector<1x32x1xf32> to vector<1xf32>
      %48 = vector.shape_cast %47 : vector<1xf32> to vector<1x1x1xf32>
      %49 = vector.extract %48[0, 0, 0] : f32 from vector<1x1x1xf32>
      %50 = vector.broadcast %49 : f32 to vector<1x1xf32>
      %cst_18 = arith.constant 5.000000e-03 : f32
      %51 = vector.broadcast %cst_18 : f32 to vector<1x1xf32>
      %52 = arith.mulf %50, %51 : vector<1x1xf32>
      %53 = vector.shape_cast %52 : vector<1x1xf32> to vector<1x1xf32>
      %54 = vector.broadcast %53 : vector<1x1xf32> to vector<8x128xf32>
      %c0_19 = arith.constant 0 : index
      %c0_20 = arith.constant 0 : index
      %55 = vector.load %arg4[%c0_19, %c0_20] : memref<8x128xf32, #tpu.memory_space<vmem>>, vector<8x128xf32>
      tpu.vector_store %arg4[%c0_19, %c0_20], %54 {strides = array<i32>} : memref<8x128xf32, #tpu.memory_space<vmem>>, vector<8x128xf32>,
    } else {
    }
    return
  }
  func.func @transform_0(%arg0: i32, %arg1: i32) -> (i32, i32) {
    %c7_i32 = arith.constant 7 : i32
    %0 = arith.muli %arg0, %c7_i32 : i32
    %1 = arith.addi %0, %arg1 : i32
    %c6_i32 = arith.constant 6 : i32
    %2 = arith.minsi %1, %c6_i32 : i32
    %c0_i32 = arith.constant 0 : i32
    %c0_i32_0 = arith.constant 0 : i32
    return %2, %c0_i32 : i32, i32
  }
  func.func @transform_1(%arg0: i32, %arg1: i32) -> (i32, i32) {
    %c7_i32 = arith.constant 7 : i32
    %0 = arith.muli %arg0, %c7_i32 : i32
    %1 = arith.addi %0, %arg1 : i32
    %c6_i32 = arith.constant 6 : i32
    %2 = arith.minsi %1, %c6_i32 : i32
    %c0_i32 = arith.constant 0 : i32
    %c0_i32_0 = arith.constant 0 : i32
    return %2, %c0_i32 : i32, i32
  }
  func.func @transform_2(%arg0: i32, %arg1: i32) -> (i32, i32) {
    %c0_i32 = arith.constant 0 : i32
    %c0_i32_0 = arith.constant 0 : i32
    return %arg0, %c0_i32 : i32, i32
  }
}

</mosaic_0001>

<bundles_post_ra>
// kernel: tpu_custom_call.1
= control target key start
LH: loop header
LB: loop body
LE: loop exit
PB: predicated region body
PF: predicated region fallthrough
CT: control target
= control target key end

     0   :  { %7 = vsyncpa [#allocation4], 0  ;;  %s680_s9 = smov 0   ;;  %s682_s10 = smov 0   ;;  %s752_s0 = inlined_call_operand.vmem [shape: f32[200,32], index: 0, kind: input, shape index: {}]   ;;  %s753_s1 = inlined_call_operand.vmem [shape: s32[200,1], index: 1, kind: input, shape index: {}]   ;;  %s754_s2 = inlined_call_operand.hbm [shape: f32[8,128], index: 2, kind: output, shape index: {}]  }
   0x1   :  { %s684_s11 = smov 0  }
   0x2 LB: > { %s529_s12 = sadd.s32 4294967295, %s660_s11   ;;  %s22_s13 = sadd.s32 1, %s656_s10  ;;  %s660_s11 = sphi %s684_s11, %s13_s11   ;;  %s656_s10 = sphi %s682_s10, %s756_s10   ;;  %s652_s9 = sphi %s680_s9, %s755_s9  }
   0x3   : > { %p23_p0 = scmp.ge.s32.totalorder %s22_s13, 7  ;;  %p532_p1 = scmp.ge.s32.totalorder %s660_s11, 1 }
   0x4   : > { %p185_p2 = scmp.lt.s32.totalorder %s660_s11, 8 }
   0x5   : > { %s758_s13 = smov (%p23_p0, %s22_s13), 0 }
   0x6   : > { %p186_p3 = pnand %p532_p1, %p185_p2 }
   0x7   : > { %p225_p4 = scmp.lt.s32.totalorder (!%p186_p3), %s652_s9, 6  ;;  %p537_p6 = scmp.ne.s32.totalorder (!%p186_p3), %s652_s9, 0 }
   0x8   : > { %189 = sbr.rel (%p186_p3) target bundleno = 529 (0x211), region = 28 }
   0xd   : > { %s226_s14 = scalar_select %p225_p4, %s652_s9, 6 }
   0xf   : > { %s533_s15 = sshll.u32 %s226_s14, 2 }
  0x10   : > { %p232_p5 = scmp.lt.s32.totalorder %s533_s15, 24  ;;  %270 = sbr.rel (%p537_p6) target bundleno = 26 (0x1a), region = 32 }
  0x12   : > { %s760_s15 = smov (!%p232_p5, %s533_s15), 24 }
  0x13   : > { %s534_s16 = sshll.u32 %s760_s15, 3 }
  0x14   : > { %s235_s19 = scalar_lea.vmem %s752_s0, %s534_s16  ;;  %s709_s22 = scalar_lea.vmem %s753_s1, %s534_s16 }
  0x15   : > { %vm271_vm0 = vcmask 7168   ;;  %v662_v0 = vmov 0.0  }
  0x16   : > { %272 = vst.msk [vmem:[#allocation2] sm:$0xff] %vm271_vm0, %v662_v0 }
  0x17   : > { %273 = vst.msk [vmem:[#allocation2 + $0x8] sm:$0xff] %vm271_vm0, %v662_v0 }
  0x18   : > { %274 = vst.msk [vmem:[#allocation2 + $0x10] sm:$0xff] %vm271_vm0, %v662_v0 }
  0x19   : > { %275 = vst.msk [vmem:[#allocation2 + $0x18] sm:$0xff] %vm271_vm0, %v662_v0 }
  0x1a PF: > { %v278_v1 = vld [vmem:[%s235_s19 + $0x10] sm:$0xff]  ;;  %vm284_vm1 = vcmask 261120   ;;  %v276_v2 = vld [vmem:[%s235_s19] sm:$0xff]  ;;  %v663_v5 = vmov 0   ;;  %v279_v7 = vld [vmem:[%s235_s19 + $0x18] sm:$0xff]  ;;  %v321_v20 = vlaneseq  ;;  %s538_s23 = sshll.u32 %s652_s9, 5 }
  0x1b   : > { %v291_v3 = vsel %vm284_vm1, %v278_v1, -inf  ;;  %v285_v4 = vsel %vm284_vm1, %v276_v2, -inf  ;;  %579 = vset.pattern.permute.xlu2 %v663_v5  ;;  %v280_v6 = vld [vmem:[%s709_s22] sm:$0xff]  ;;  %580 = vset.pattern.permute.xlu0 %v663_v5  ;;  %v277_v8 = vld [vmem:[%s235_s19 + $0x8] sm:$0xff]  ;;  %v294_v9 = vsel %vm284_vm1, %v279_v7, -inf  ;;  %v282_v12 = vld [vmem:[%s709_s22 + $0x10] sm:$0xff]  ;;  %v403_v60 = vstv %s538_s23 }
  0x1c   : > { %292 = vmax.xlane.f32.xlu1 %v291_v3  ;;  %286 = vmax.xlane.f32.xlu0 %v285_v4  ;;  %v288_v10 = vsel %vm284_vm1, %v277_v8, -inf  ;;  %v281_v11 = vld [vmem:[%s709_s22 + $0x8] sm:$0xff]  ;;  %v283_v13 = vld [vmem:[%s709_s22 + $0x18] sm:$0xff]  ;;  %v322_v25 = vand.u32 127, %v321_v20  ;;  %v399_v59 = vshrl.u32 %v321_v20, 7  ;;  %vm424_vm7 = vcmask 7168  }
  0x1d   : > { %324 = vperm.xlu2 %579, %v280_v6   ;;  %581 = vset.pattern.permute.xlu1 %v663_v5  ;;  %p539_p7 = scmp.ne.s32.totalorder %s652_s9, 6 }
  0x24   : > { %295 = vmax.xlane.f32.xlu1 %v294_v9  ;;  %289 = vmax.xlane.f32.xlu0 %v288_v10 }
  0x25   : > { %327 = vperm.xlu2 %579, %v281_v11  }
  0x38   : > { %330 = vperm.xlu0 %580, %v282_v12   ;;  %v416_v12 = vld [vmem:[#allocation2] sm:$0xff] }
  0x3d   : > { %333 = vperm.xlu1 %581, %v283_v13  }
  0x77   : > { %v325_v27 = vpop.permute.xlu2 %324 }
  0x78   : > { %vm335_vm2 = vcmp.eq.s32.totalorder %v322_v25, %v325_v27 }
  0x7f   : > { %v328_v39 = vpop.permute.xlu2 %327 }
  0x80   : > { %vm336_vm3 = vcmp.eq.s32.totalorder %v322_v25, %v328_v39  ;;  %v419_v39 = vld [vmem:[#allocation2 + $0x18] sm:$0xff] }
  0x8f   : > { %v287_v14 = vpop.xlane.xlu0 %286  ;;  %v293_v15 = vpop.xlane.xlu1 %292 }
  0x90   : > { %v297_v16 = vsub.f32 %v276_v2, %v287_v14  ;;  %v299_v17 = vsub.f32 %v278_v1, %v293_v15  ;;  %v404_v1 = vadd.s32 %v403_v60, %v399_v59 }
  0x92   : > { %v301_v18 = vmul.f32 1.442695, %v297_v16  ;;  %v305_v19 = vmul.f32 1.442695, %v299_v17  ;;  %v339_v33 = vsel %vm335_vm2, %v297_v16, 0.0  ;;  %vm408_vm6 = vcmp.lt.s32.totalorder %v404_v1, 200 }
  0x93   : > { %v343_v35 = vsel %vm284_vm1, %v339_v33, 0.0 }
  0x94   : > { %582 = vpow2.f32 %v301_v18 }
  0x95   : > { %584 = vpow2.f32 %v305_v19 }
  0x97   : > { %v290_v21 = vpop.xlane.xlu0 %289  ;;  %v296_v22 = vpop.xlane.xlu1 %295 }
  0x98   : > { %v298_v23 = vsub.f32 %v277_v8, %v290_v21  ;;  %v300_v24 = vsub.f32 %v279_v7, %v296_v22  ;;  %v400_v21 = vadd.s32 8, %v399_v59 }
  0x9a   : > { %v583_v26 = vpop.eup %582  ;;  %v303_v28 = vmul.f32 1.442695, %v298_v23  ;;  %v307_v31 = vmul.f32 1.442695, %v300_v24  ;;  %v340_v41 = vsel %vm336_vm3, %v298_v23, 0.0  ;;  %v402_v23 = vadd.s32 24, %v399_v59 }
  0x9b   : > { %v585_v29 = vpop.eup %584  ;;  %v309_v30 = vsel %vm284_vm1, %v583_v26, 0.0  ;;  %v346_v45 = vsel %vm284_vm1, %v340_v41, 0.0 }
  0x9c   : > { %310 = vadd.xlane.f32.xlu2 %v309_v30  ;;  %586 = vpow2.f32 %v303_v28  ;;  %v315_v32 = vsel %vm284_vm1, %v585_v29, 0.0  ;;  %v405_v29 = vadd.s32 %v403_v60, %v400_v21  ;;  %v407_v30 = vadd.s32 %v403_v60, %v402_v23 }
  0x9d   : > { %316 = vadd.xlane.f32.xlu0 %v315_v32  ;;  %588 = vpow2.f32 %v307_v31 }
  0x9e   : > { %vm409_vm8 = vcmp.lt.s32.totalorder %v405_v29, 200  ;;  %vm411_vm9 = vcmp.lt.s32.totalorder %v407_v30, 200 }
  0xa2   : > { %v587_v34 = vpop.eup %586 }
  0xa3   : > { %v312_v36 = vsel %vm284_vm1, %v587_v34, 0.0  ;;  %v589_v37 = vpop.eup %588 }
  0xa4   : > { %344 = vadd.xlane.f32.xlu2 %v343_v35  ;;  %313 = vadd.xlane.f32.xlu1 %v312_v36  ;;  %v318_v38 = vsel %vm284_vm1, %v589_v37, 0.0  ;;  %v401_v35 = vadd.s32 16, %v399_v59  ;;  %v417_v36 = vld [vmem:[#allocation2 + $0x8] sm:$0xff] }
  0xaa   : > { %v331_v43 = vpop.permute.xlu0 %330 }
  0xab   : > { %vm337_vm5 = vcmp.eq.s32.totalorder %v322_v25, %v331_v43 }
  0xac   : > { %319 = vadd.xlane.f32.xlu2 %v318_v38  ;;  %v341_v46 = vsel %vm337_vm5, %v299_v17, 0.0 }
  0xad   : > { %v349_v47 = vsel %vm284_vm1, %v341_v46, 0.0 }
  0xaf   : > { %v334_v40 = vpop.permute.xlu1 %333 }
  0xb0   : > { %vm338_vm4 = vcmp.eq.s32.totalorder %v322_v25, %v334_v40 }
  0xb1   : > { %v342_v42 = vsel %vm338_vm4, %v300_v24, 0.0 }
  0xb2   : > { %v352_v44 = vsel %vm284_vm1, %v342_v42, 0.0 }
  0xb3   : > { %353 = vadd.xlane.f32.xlu1 %v352_v44 }
  0xb4   : > { %347 = vadd.xlane.f32.xlu2 %v346_v45  ;;  %v406_v45 = vadd.s32 %v403_v60, %v401_v35 }
  0xb6   : > { %vm410_vm10 = vcmp.lt.s32.totalorder %v406_v45, 200 }
  0xbc   : > { %350 = vadd.xlane.f32.xlu2 %v349_v47 }
 0x10f   : > { %v311_v48 = vpop.xlane.xlu2 %310 }
 0x110   : > { %590 = vlog2.f32 %v311_v48  ;;  %v317_v58 = vpop.xlane.xlu0 %316 }
 0x116   : > { %v591_v49 = vpop.eup %590 }
 0x117   : > { %v356_v50 = vmul.f32 0.6931472, %v591_v49  ;;  %v345_v51 = vpop.xlane.xlu2 %344  ;;  %v314_v52 = vpop.xlane.xlu1 %313  ;;  %v418_v49 = vld [vmem:[#allocation2 + $0x10] sm:$0xff] }
 0x118   : > { %592 = vlog2.f32 %v314_v52 }
 0x119   : > { %v363_v53 = vsub.f32 %v356_v50, %v345_v51 }
 0x11b   : > { %v367_v54 = vsub.f32 0.0, %v363_v53 }
 0x11d   : > { %v371_v55 = vmul.f32 1.442695, %v367_v54 }
 0x11e   : > { %v593_v57 = vpop.eup %592 }
 0x11f   : > { %594 = vpow2.f32 %v371_v55  ;;  %v320_v56 = vpop.xlane.xlu2 %319  ;;  %v358_v61 = vmul.f32 0.6931472, %v593_v57 }
 0x120   : > { %596 = vlog2.f32 %v320_v56 }
 0x121   : > { %598 = vlog2.f32 %v317_v58 }
 0x125   : > { %v595_v62 = vpop.eup %594 }
 0x126   : > { %v597_v63 = vpop.eup %596  ;;  %v379_v0 = vsub.f32 1.0, %v595_v62  ;;  %v354_v5 = vpop.xlane.xlu1 %353 }
 0x127   : > { %v362_v2 = vmul.f32 0.6931472, %v597_v63  ;;  %v348_v3 = vpop.xlane.xlu2 %347  ;;  %v599_v10 = vpop.eup %598 }
 0x128   : > { %v383_v4 = vmul.f32 %v379_v0, %v379_v0  ;;  %v364_v6 = vsub.f32 %v358_v61, %v348_v3  ;;  %v360_v17 = vmul.f32 0.6931472, %v599_v10 }
 0x129   : > { %v366_v7 = vsub.f32 %v362_v2, %v354_v5 }
 0x12a   : > { %v387_v8 = vmul.f32 %v383_v4, %v379_v0  ;;  %v368_v9 = vsub.f32 0.0, %v364_v6 }
 0x12b   : > { %v370_v11 = vsub.f32 0.0, %v366_v7 }
 0x12c   : > { %v391_v13 = vmul.f32 %v387_v8, %v363_v53  ;;  %v373_v14 = vmul.f32 1.442695, %v368_v9 }
 0x12d   : > { %v377_v15 = vmul.f32 1.442695, %v370_v11 }
 0x12e   : > { %v412_v16 = vsel %vm408_vm6, %v391_v13, 0.0  ;;  %600 = vpow2.f32 %v373_v14 }
 0x12f   : > { %v420_v18 = vadd.f32 %v416_v12, %v412_v16  ;;  %602 = vpow2.f32 %v377_v15  ;;  %v351_v19 = vpop.xlane.xlu2 %350 }
 0x130   : > { %v365_v20 = vsub.f32 %v360_v17, %v351_v19 }
 0x131   : > { %425 = vst.msk [vmem:[#allocation2] sm:$0xff] %vm424_vm7, %v420_v18 }
 0x132   : > { %v369_v22 = vsub.f32 0.0, %v365_v20 }
 0x134   : > { %v601_v24 = vpop.eup %600  ;;  %v375_v25 = vmul.f32 1.442695, %v369_v22 }
 0x135   : > { %v603_v26 = vpop.eup %602  ;;  %v380_v27 = vsub.f32 1.0, %v601_v24 }
 0x136   : > { %v382_v28 = vsub.f32 1.0, %v603_v26  ;;  %604 = vpow2.f32 %v375_v25 }
 0x137   : > { %v384_v31 = vmul.f32 %v380_v27, %v380_v27 }
 0x138   : > { %v386_v32 = vmul.f32 %v382_v28, %v382_v28 }
 0x139   : > { %v388_v33 = vmul.f32 %v384_v31, %v380_v27 }
 0x13a   : > { %v390_v34 = vmul.f32 %v386_v32, %v382_v28 }
 0x13b   : > { %v392_v37 = vmul.f32 %v388_v33, %v364_v6 }
 0x13c   : > { %v605_v38 = vpop.eup %604  ;;  %v394_v40 = vmul.f32 %v390_v34, %v366_v7 }
 0x13d   : > { %v413_v41 = vsel %vm409_vm8, %v392_v37, 0.0  ;;  %v381_v42 = vsub.f32 1.0, %v605_v38 }
 0x13e   : > { %v415_v43 = vsel %vm411_vm9, %v394_v40, 0.0  ;;  %v421_v44 = vadd.f32 %v417_v36, %v413_v41 }
 0x13f   : > { %v423_v46 = vadd.f32 %v419_v39, %v415_v43  ;;  %v385_v47 = vmul.f32 %v381_v42, %v381_v42 }
 0x140   : > { %426 = vst.msk [vmem:[#allocation2 + $0x8] sm:$0xff] %vm424_vm7, %v421_v44 }
 0x141   : > { %428 = vst.msk [vmem:[#allocation2 + $0x18] sm:$0xff] %vm424_vm7, %v423_v46  ;;  %v389_v48 = vmul.f32 %v385_v47, %v381_v42 }
 0x143   : > { %v393_v50 = vmul.f32 %v389_v48, %v365_v20 }
 0x144   : > { %432 = sbr.rel (%p539_p7) target bundleno = 523 (0x20b), region = 36 }
 0x145   : > { %v414_v51 = vsel %vm410_vm10, %v393_v50, 0.0 }
 0x146   : > { %v422_v52 = vadd.f32 %v418_v49, %v414_v51 }
 0x148   : > { %427 = vst.msk [vmem:[#allocation2 + $0x10] sm:$0xff] %vm424_vm7, %v422_v52 }
 0x149   : > { %v433_v53 = vld [vmem:[#allocation2] sm:$0xff]  ;;  %v434_v54 = vld [vmem:[#allocation2 + $0x8] sm:$0xff]  ;;  %v436_v56 = vld [vmem:[#allocation2 + $0x18] sm:$0xff] }
 0x14a   : > { %v437_v57 = vsel %vm424_vm7, %v433_v53, 0.0  ;;  %v438_v58 = vsel %vm424_vm7, %v434_v54, 0.0  ;;  %v442_v61 = vsel %vm424_vm7, %v436_v56, 0.0 }
 0x14b   : > { %v439_v60 = vadd.f32 %v438_v58, %v437_v57 }
 0x14f   : > { %v435_v55 = vld [vmem:[#allocation2 + $0x10] sm:$0xff] }
 0x150   : > { %v440_v59 = vsel %vm424_vm7, %v435_v55, 0.0 }
 0x151   : > { %v441_v62 = vadd.f32 %v440_v59, %v439_v60 }
 0x153   : > { %v443_v63 = vadd.f32 %v442_v61, %v441_v62 }
 0x155   : > { %444 = vadd.xlane.f32.xlu0 %v443_v63 }
 0x1c8   : > { %v445_v0 = vpop.xlane.xlu0 %444 }
 0x1c9   : > { %v446_v1 = vrot.slane %v445_v0, 4 }
 0x1cb   : > { %v447_v2 = vadd.f32 %v446_v1, %v445_v0 }
 0x1cd   : > { %v448_v3 = vrot.slane %v447_v2, 2 }
 0x1cf   : > { %v449_v4 = vadd.f32 %v448_v3, %v447_v2 }
 0x1d1   : > { %v450_v5 = vrot.slane %v449_v4, 1 }
 0x1d3   : > { %v451_v6 = vadd.f32 %v450_v5, %v449_v4 }
 0x1d5   : > { %544 = vpush %v451_v6 }
 0x206   : > { %s545_s24 = spop %544 }
 0x207   : > { %v453_v7 = vstv %s545_s24 }
 0x208   : > { %v454_v8 = vmul.f32 0.005, %v453_v7 }
 0x20a   : > { %455 = vst [vmem:[#allocation3] sm:$0xff] %v454_v8 }
 0x20b PF: > { %p550_p8 = scmp.eq.s32.totalorder %s529_s12, 6  ;;  %s466_s27 = sshll.u32 %s754_s2, 4  ;;  %s467_s27 = int_to_ptr.hbm [resolvable:$true] %s466_s27 }
 0x20c   : > { %s664_s28 = smov [#allocation3]  }
 0x20d   : > { %s464_s29 = sshll.u32 %s664_s28, 4  ;;  %s465_s29 = int_to_ptr.vmem [resolvable:$true] %s464_s29 }
 0x20e   : > { %547 = dma.vmem_to_hbm [thread:$0]  (%p550_p8), %s465_s29, 128, %s467_s27, [#allocation4]  }
 0x20f   : > { %647 = dma.done.wait (%p550_p8), [#allocation4], 128  }
 0x210   : > { %649 = vsyncadd (%p550_p8), [#allocation4], 4294967168 }
 0x211 PF: > { %s13_s11 = sadd.s32 1, %s660_s11   ;;  %s755_s9 = smov %s656_s10 }
 0x212   : > { %p10_p9 = scmp.ge.s32.totalorder %s13_s11, 9   ;;  %s756_s10 = smov %s758_s13 }
 0x214   :  { %12 = sbr.rel (!%p10_p9) target bundleno = 2 (0x2), region = 67 }
 0x219   :  { %480 = vsyncpa [#allocation4], 1 }
 0x21a   :  { %482 = vsyncpa [#allocation4 + $0x1], 1 }

</bundles_post_ra>
